<compile_context>
chip_gen: v5e
topology: v5e:2x2
jax: 0.10.0
libtpu: 0.0.40
codegen_flags: <defaults>
</compile_context>

<pallas_src>
import functools

import jax
import jax.numpy as jnp
from jax.experimental import pallas as pl
from jax.experimental.pallas import tpu as pltpu

IN_FEATURES = 32 * 32 * 3          # 3072
HIDDEN_SIZES = (128, 64)           # "trial.suggest_int('n_units_l{i}', 4, 500)"
OUT_FEATURES = 10
OUT_PADDED = 128                   # lane-dense padded logits width
MAX_TB = 512                       # batch-tile rows (~3 MiB bf16 per x tile)


def _round_up(x, m):
    return (x + m - 1) // m * m


def _mlp_kernel(x_ref, w1_ref, b1_ref, w2_ref, b2_ref, w3_ref, b3_ref, o_ref):
    """Fused 3-layer MLP on one batch tile.

    x_ref:  (TB, 3072) bf16      w1_ref: (3072, 128) bf16   b1_ref: (1, 128) f32
    w2_ref: (128, 64)  bf16      b2_ref: (1, 64)  f32
    w3_ref: (64, 128)  bf16 (padded)     b3_ref: (1, 128) f32 (padded)
    o_ref:  (TB, 128)  f32 (padded logits; cols 10.. are zero)
    """
    x = x_ref[...]

    # Layer 1 (dominant: K=3072, N=128) — bf16 MXU, f32 accumulate.
    h1 = jnp.dot(x, w1_ref[...], preferred_element_type=jnp.float32)
    h1 = jnp.maximum(h1 + b1_ref[...], 0.0)          # f32 VPU

    # Layer 2.
    h2 = jnp.dot(h1.astype(w2_ref.dtype), w2_ref[...],
                 preferred_element_type=jnp.float32)
    h2 = jnp.maximum(h2 + b2_ref[...], 0.0)           # f32 VPU

    # Output layer (padded to 128 lanes for an unmasked, lane-dense store).
    logits = jnp.dot(h2.astype(w3_ref.dtype), w3_ref[...],
                     preferred_element_type=jnp.float32)
    o_ref[...] = (logits + b3_ref[...]).astype(o_ref.dtype)


@jax.jit
def neural_network_forward(x_nchw, params):
    """Forward pass equivalent to the PyTorch module.

    x_nchw: (B, 3, 32, 32) float32, NCHW like PyTorch.
    params: dict with w1 (3072,128), b1 (1,128), w2 (128,64), b2 (1,64),
            w3 (64,10), b3 (1,10).  (Weights stored as (in, out), i.e. the
            transpose of torch.nn.Linear.weight.)
    Returns logits of shape (B, 10), float32.
    """
    b = x_nchw.shape[0]
    # nn.Flatten(): row-major flatten over (C, H, W) -> (B, 3072)
    x = x_nchw.reshape(b, -1)

    # bf16 activations/weights (halve HBM bytes); biases stay f32.
    x = x.astype(jnp.bfloat16)
    w1 = params["w1"].astype(jnp.bfloat16)
    w2 = params["w2"].astype(jnp.bfloat16)
    b1 = params["b1"].astype(jnp.float32)
    b2 = params["b2"].astype(jnp.float32)

    # Zero-pad the output layer to 128 lanes; padded columns produce zeros
    # and are sliced off after the kernel.
    w3 = jnp.zeros((HIDDEN_SIZES[-1], OUT_PADDED), jnp.bfloat16)
    w3 = w3.at[:, :OUT_FEATURES].set(params["w3"].astype(jnp.bfloat16))
    b3 = jnp.zeros((1, OUT_PADDED), jnp.float32)
    b3 = b3.at[:, :OUT_FEATURES].set(params["b3"].astype(jnp.float32))

    # Batch tiling: multiple of 16 rows (bf16 sublane packing), up to MAX_TB.
    tb = min(MAX_TB, _round_up(b, 16))
    b_pad = _round_up(b, tb)
    if b_pad != b:
        x = jnp.pad(x, ((0, b_pad - b), (0, 0)))
    n_tiles = b_pad // tb

    weight_bytes = (IN_FEATURES * HIDDEN_SIZES[0]
                    + HIDDEN_SIZES[0] * HIDDEN_SIZES[1]
                    + HIDDEN_SIZES[1] * OUT_PADDED) * 2 \
                   + (HIDDEN_SIZES[0] + HIDDEN_SIZES[1] + OUT_PADDED) * 4
    cost = pl.CostEstimate(
        flops=2 * b_pad * (IN_FEATURES * HIDDEN_SIZES[0]
                           + HIDDEN_SIZES[0] * HIDDEN_SIZES[1]
                           + HIDDEN_SIZES[1] * OUT_PADDED),
        transcendentals=0,
        bytes_accessed=b_pad * IN_FEATURES * 2      # bf16 activations in
                       + weight_bytes               # weights/biases
                       + b_pad * OUT_PADDED * 4)    # f32 padded logits out

    out = pl.pallas_call(
        _mlp_kernel,
        out_shape=jax.ShapeDtypeStruct((b_pad, OUT_PADDED), jnp.float32),
        grid=(n_tiles,),
        in_specs=[
            pl.BlockSpec((tb, IN_FEATURES), lambda i: (i, 0)),   # x tile
            pl.BlockSpec(w1.shape, lambda i: (0, 0)),            # VMEM-resident
            pl.BlockSpec(b1.shape, lambda i: (0, 0)),
            pl.BlockSpec(w2.shape, lambda i: (0, 0)),
            pl.BlockSpec(b2.shape, lambda i: (0, 0)),
            pl.BlockSpec(w3.shape, lambda i: (0, 0)),
            pl.BlockSpec(b3.shape, lambda i: (0, 0)),
        ],
        out_specs=pl.BlockSpec((tb, OUT_PADDED), lambda i: (i, 0)),
        compiler_params=pltpu.CompilerParams(
            dimension_semantics=("parallel",),     # megacore on v7x
            vmem_limit_bytes=48 << 20),            # safe on v7x's 64 MiB VMEM
        cost_estimate=cost,
    )(x, w1, b1, w2, b2, w3, b3)

    return out[:b, :OUT_FEATURES]


def init_params(key):
    """Deterministic synthetic parameters (PyTorch-Linear-style uniform init)."""
    dims = (IN_FEATURES,) + HIDDEN_SIZES + (OUT_FEATURES,)
    params = {}
    for i, (fan_in, fan_out) in enumerate(zip(dims[:-1], dims[1:]), start=1):
        key, kw, kb = jax.random.split(key, 3)
        bound = 1.0 / jnp.sqrt(jnp.float32(fan_in))
        params[f"w{i}"] = jax.random.uniform(
            kw, (fan_in, fan_out), jnp.float32, -bound, bound)
        params[f"b{i}"] = jax.random.uniform(
            kb, (1, fan_out), jnp.float32, -bound, bound)
    return params


def _reference_forward(x_nchw, params):
    """Pure-JAX f32 reference for a sanity check."""
    h = x_nchw.reshape(x_nchw.shape[0], -1)
    h = jnp.maximum(h @ params["w1"] + params["b1"], 0.0)
    h = jnp.maximum(h @ params["w2"] + params["b2"], 0.0)
    return h @ params["w3"] + params["b3"]


if __name__ == "__main__":
    key = jax.random.PRNGKey(0)
    key, kx1, kx2 = jax.random.split(key, 3)
    params = init_params(key)

    # Small primary check (batch=2): single padded tile.
    x_small = jax.random.normal(kx1, (2, 3, 32, 32), jnp.float32)
    logits_small = jax.block_until_ready(neural_network_forward(x_small, params))
    ref_small = _reference_forward(x_small, params)
    assert logits_small.shape == (2, OUT_FEATURES)
    assert jnp.allclose(logits_small, ref_small, atol=3e-2, rtol=3e-2), \
        "mismatch vs reference (batch=2)"

    # Secondary check exercising multi-tile grid + batch padding (B=520 -> 2 tiles).
    x_big = jax.random.normal(kx2, (520, 3, 32, 32), jnp.float32)
    logits_big = jax.block_until_ready(neural_network_forward(x_big, params))
    ref_big = _reference_forward(x_big, params)
    assert logits_big.shape == (520, OUT_FEATURES)
    assert jnp.allclose(logits_big, ref_big, atol=3e-2, rtol=3e-2), \
        "mismatch vs reference (batch=520)"

    print("KERNEL_OK")
</pallas_src>

<mosaic_0001>
module attributes {stable_mosaic.version = 11 : i64} {
  func.func @_mlp_kernel(%arg0: i32, %arg1: memref<16x3072xbf16, #tpu.memory_space<vmem>>, %arg2: memref<3072x128xbf16, #tpu.memory_space<vmem>>, %arg3: memref<1x128xf32, #tpu.memory_space<vmem>>, %arg4: memref<128x64xbf16, #tpu.memory_space<vmem>>, %arg5: memref<1x64xf32, #tpu.memory_space<vmem>>, %arg6: memref<64x128xbf16, #tpu.memory_space<vmem>>, %arg7: memref<1x128xf32, #tpu.memory_space<vmem>>, %arg8: memref<16x128xf32, #tpu.memory_space<vmem>>) attributes {dimension_semantics = [#tpu.dimension_semantics<parallel>], iteration_bounds = array<i64: 1>, scalar_prefetch = 0 : i64, scratch_operands = 0 : i64, tpu.core_type = #tpu.core_type<tc>, window_params = [{transform_indices = @transform_0, window_bounds = array<i64: 16, 3072>}, {pipeline_mode = #tpu.pipeline_mode<synchronous>, transform_indices = @transform_1, window_bounds = array<i64: 3072, 128>}, {pipeline_mode = #tpu.pipeline_mode<synchronous>, transform_indices = @transform_2, window_bounds = array<i64: 1, 128>}, {pipeline_mode = #tpu.pipeline_mode<synchronous>, transform_indices = @transform_3, window_bounds = array<i64: 128, 64>}, {pipeline_mode = #tpu.pipeline_mode<synchronous>, transform_indices = @transform_4, window_bounds = array<i64: 1, 64>}, {pipeline_mode = #tpu.pipeline_mode<synchronous>, transform_indices = @transform_5, window_bounds = array<i64: 64, 128>}, {pipeline_mode = #tpu.pipeline_mode<synchronous>, transform_indices = @transform_6, window_bounds = array<i64: 1, 128>}, {transform_indices = @transform_7, window_bounds = array<i64: 16, 128>}]} {
    %c0 = arith.constant 0 : index
    %c0_0 = arith.constant 0 : index
    %0 = vector.load %arg1[%c0, %c0_0] : memref<16x3072xbf16, #tpu.memory_space<vmem>>, vector<16x3072xbf16>
    %c0_1 = arith.constant 0 : index
    %c0_2 = arith.constant 0 : index
    %1 = vector.load %arg2[%c0_1, %c0_2] : memref<3072x128xbf16, #tpu.memory_space<vmem>>, vector<3072x128xbf16>
    %cst = arith.constant dense<0.000000e+00> : vector<16x128xf32>
    %2 = tpu.matmul %0, %1, %cst {dimension_numbers = #tpu.dot_dimension_numbers<[1], [0], [0], [1], [0, 0, 1, 1], [], []>} : vector<16x3072xbf16>, vector<3072x128xbf16>, vector<16x128xf32> -> vector<16x128xf32>
    %c0_3 = arith.constant 0 : index
    %c0_4 = arith.constant 0 : index
    %3 = vector.load %arg3[%c0_3, %c0_4] : memref<1x128xf32, #tpu.memory_space<vmem>>, vector<1x128xf32>
    %4 = vector.broadcast %3 : vector<1x128xf32> to vector<16x128xf32>
    %5 = arith.addf %2, %4 : vector<16x128xf32>
    %cst_5 = arith.constant 0.000000e+00 : f32
    %6 = vector.broadcast %cst_5 : f32 to vector<16x128xf32>
    %7 = arith.maximumf %5, %6 : vector<16x128xf32>
    %8 = arith.truncf %7 : vector<16x128xf32> to vector<16x128xbf16>
    %c0_6 = arith.constant 0 : index
    %c0_7 = arith.constant 0 : index
    %9 = vector.load %arg4[%c0_6, %c0_7] : memref<128x64xbf16, #tpu.memory_space<vmem>>, vector<128x64xbf16>
    %cst_8 = arith.constant dense<0.000000e+00> : vector<16x64xf32>
    %10 = tpu.matmul %8, %9, %cst_8 {dimension_numbers = #tpu.dot_dimension_numbers<[1], [0], [0], [1], [0, 0, 1, 1], [], []>} : vector<16x128xbf16>, vector<128x64xbf16>, vector<16x64xf32> -> vector<16x64xf32>
    %c0_9 = arith.constant 0 : index
    %c0_10 = arith.constant 0 : index
    %11 = vector.load %arg5[%c0_9, %c0_10] : memref<1x64xf32, #tpu.memory_space<vmem>>, vector<1x64xf32>
    %12 = vector.broadcast %11 : vector<1x64xf32> to vector<16x64xf32>
    %13 = arith.addf %10, %12 : vector<16x64xf32>
    %cst_11 = arith.constant 0.000000e+00 : f32
    %14 = vector.broadcast %cst_11 : f32 to vector<16x64xf32>
    %15 = arith.maximumf %13, %14 : vector<16x64xf32>
    %16 = arith.truncf %15 : vector<16x64xf32> to vector<16x64xbf16>
    %c0_12 = arith.constant 0 : index
    %c0_13 = arith.constant 0 : index
    %17 = vector.load %arg6[%c0_12, %c0_13] : memref<64x128xbf16, #tpu.memory_space<vmem>>, vector<64x128xbf16>
    %cst_14 = arith.constant dense<0.000000e+00> : vector<16x128xf32>
    %18 = tpu.matmul %16, %17, %cst_14 {dimension_numbers = #tpu.dot_dimension_numbers<[1], [0], [0], [1], [0, 0, 1, 1], [], []>} : vector<16x64xbf16>, vector<64x128xbf16>, vector<16x128xf32> -> vector<16x128xf32>
    %c0_15 = arith.constant 0 : index
    %c0_16 = arith.constant 0 : index
    %19 = vector.load %arg7[%c0_15, %c0_16] : memref<1x128xf32, #tpu.memory_space<vmem>>, vector<1x128xf32>
    %20 = vector.broadcast %19 : vector<1x128xf32> to vector<16x128xf32>
    %21 = arith.addf %18, %20 : vector<16x128xf32>
    %c0_17 = arith.constant 0 : index
    %c0_18 = arith.constant 0 : index
    %22 = vector.load %arg8[%c0_17, %c0_18] : memref<16x128xf32, #tpu.memory_space<vmem>>, vector<16x128xf32>
    tpu.vector_store %arg8[%c0_17, %c0_18], %21 {strides = array<i32>} : memref<16x128xf32, #tpu.memory_space<vmem>>, vector<16x128xf32>,
    return
  }
  func.func @transform_0(%arg0: i32) -> (i32, i32) {
    %c0_i32 = arith.constant 0 : i32
    %c0_i32_0 = arith.constant 0 : i32
    return %arg0, %c0_i32 : i32, i32
  }
  func.func @transform_1(%arg0: i32) -> (i32, i32) {
    %c0_i32 = arith.constant 0 : i32
    %c0_i32_0 = arith.constant 0 : i32
    %c0_i32_1 = arith.constant 0 : i32
    return %c0_i32, %c0_i32_0 : i32, i32
  }
  func.func @transform_2(%arg0: i32) -> (i32, i32) {
    %c0_i32 = arith.constant 0 : i32
    %c0_i32_0 = arith.constant 0 : i32
    %c0_i32_1 = arith.constant 0 : i32
    return %c0_i32, %c0_i32_0 : i32, i32
  }
  func.func @transform_3(%arg0: i32) -> (i32, i32) {
    %c0_i32 = arith.constant 0 : i32
    %c0_i32_0 = arith.constant 0 : i32
    %c0_i32_1 = arith.constant 0 : i32
    return %c0_i32, %c0_i32_0 : i32, i32
  }
  func.func @transform_4(%arg0: i32) -> (i32, i32) {
    %c0_i32 = arith.constant 0 : i32
    %c0_i32_0 = arith.constant 0 : i32
    %c0_i32_1 = arith.constant 0 : i32
    return %c0_i32, %c0_i32_0 : i32, i32
  }
  func.func @transform_5(%arg0: i32) -> (i32, i32) {
    %c0_i32 = arith.constant 0 : i32
    %c0_i32_0 = arith.constant 0 : i32
    %c0_i32_1 = arith.constant 0 : i32
    return %c0_i32, %c0_i32_0 : i32, i32
  }
  func.func @transform_6(%arg0: i32) -> (i32, i32) {
    %c0_i32 = arith.constant 0 : i32
    %c0_i32_0 = arith.constant 0 : i32
    %c0_i32_1 = arith.constant 0 : i32
    return %c0_i32, %c0_i32_0 : i32, i32
  }
  func.func @transform_7(%arg0: i32) -> (i32, i32) {
    %c0_i32 = arith.constant 0 : i32
    %c0_i32_0 = arith.constant 0 : i32
    return %arg0, %c0_i32 : i32, i32
  }
}

</mosaic_0001>

<bundles_post_ra>
// kernel: neural_network_forward.1
= control target key start
LH: loop header
LB: loop body
LE: loop exit
PB: predicated region body
PF: predicated region fallthrough
CT: control target
= control target key end

     0   :  { %vm2171_vm0 = vcmask 523264   ;;  %s4150_s1 = inlined_call_operand.vmem [shape: bf16[3072,128], index: 1, kind: input, shape index: {}]   ;;  %s4151_s0 = inlined_call_operand.vmem [shape: bf16[16,3072], index: 0, kind: input, shape index: {}]   ;;  %s4152_s2 = inlined_call_operand.vmem [shape: f32[1,128], index: 2, kind: input, shape index: {}]   ;;  %s4153_s4 = inlined_call_operand.vmem [shape: f32[1,64], index: 4, kind: input, shape index: {}]   ;;  %s4154_s3 = inlined_call_operand.vmem [shape: bf16[128,64], index: 3, kind: input, shape index: {}]   ;;  %s4155_s5 = inlined_call_operand.vmem [shape: bf16[64,128], index: 5, kind: input, shape index: {}]   ;;  %s4156_s6 = inlined_call_operand.vmem [shape: f32[1,128], index: 6, kind: input, shape index: {}]   ;;  %s4157_s7 = inlined_call_operand.vmem [shape: f32[16,128], index: 7, kind: output, shape index: {}]  }
   0x1   :  { %v3139_v0 = vld [vmem:[%s4150_s1 + $0x38] sm:$0xff]  ;;  %v3138_v4 = vld [vmem:[%s4150_s1 + $0x30] sm:$0xff]  ;;  %v3137_v8 = vld [vmem:[%s4150_s1 + $0x28] sm:$0xff] }
   0x2   :  { %v3147_v1 = vld [vmem:[%s4150_s1 + $0x78] sm:$0xff]  ;;  %1711 = vmatpush.bf16.msra.mxu0 %v3139_v0  ;;  %v3146_v5 = vld [vmem:[%s4150_s1 + $0x70] sm:$0xff]  ;;  %v3145_v9 = vld [vmem:[%s4150_s1 + $0x68] sm:$0xff] }
   0x3   :  { %v3155_v2 = vld [vmem:[%s4150_s1 + $0xb8] sm:$0xff]  ;;  %1725 = vmatpush.bf16.msra.mxu1 %v3147_v1  ;;  %v3154_v6 = vld [vmem:[%s4150_s1 + $0xb0] sm:$0xff]  ;;  %v3153_v10 = vld [vmem:[%s4150_s1 + $0xa8] sm:$0xff] }
   0x4   :  { %v3163_v3 = vld [vmem:[%s4150_s1 + $0xf8] sm:$0xff]  ;;  %1739 = vmatpush.bf16.msra.mxu2 %v3155_v2  ;;  %v3162_v7 = vld [vmem:[%s4150_s1 + $0xf0] sm:$0xff]  ;;  %v3161_v11 = vld [vmem:[%s4150_s1 + $0xe8] sm:$0xff] }
   0x5   :  { %1753 = vmatpush.bf16.msra.mxu3 %v3163_v3  ;;  %v3136_v12 = vld [vmem:[%s4150_s1 + $0x20] sm:$0xff]  ;;  %v3135_v16 = vld [vmem:[%s4150_s1 + $0x18] sm:$0xff]  ;;  %v3134_v20 = vld [vmem:[%s4150_s1 + $0x10] sm:$0xff] }
   0x6   :  { %1712 = vmatpush.bf16.msra.mxu0 %v3138_v4  ;;  %v3144_v13 = vld [vmem:[%s4150_s1 + $0x60] sm:$0xff]  ;;  %v3143_v17 = vld [vmem:[%s4150_s1 + $0x58] sm:$0xff]  ;;  %v3142_v21 = vld [vmem:[%s4150_s1 + $0x50] sm:$0xff] }
   0x7   :  { %1726 = vmatpush.bf16.msra.mxu1 %v3146_v5  ;;  %v3152_v14 = vld [vmem:[%s4150_s1 + $0xa0] sm:$0xff]  ;;  %v3151_v18 = vld [vmem:[%s4150_s1 + $0x98] sm:$0xff]  ;;  %v3150_v22 = vld [vmem:[%s4150_s1 + $0x90] sm:$0xff] }
   0x8   :  { %1740 = vmatpush.bf16.msra.mxu2 %v3154_v6  ;;  %v3160_v15 = vld [vmem:[%s4150_s1 + $0xe0] sm:$0xff]  ;;  %v3159_v19 = vld [vmem:[%s4150_s1 + $0xd8] sm:$0xff]  ;;  %v3158_v23 = vld [vmem:[%s4150_s1 + $0xd0] sm:$0xff] }
   0x9   :  { %1754 = vmatpush.bf16.msra.mxu3 %v3162_v7  ;;  %v3133_v24 = vld [vmem:[%s4150_s1 + $0x8] sm:$0xff]  ;;  %v3132_v28 = vld [vmem:[%s4150_s1] sm:$0xff]  ;;  %v3171_v32 = vld [vmem:[%s4150_s1 + $0x138] sm:$0xff] }
   0xa   :  { %1713 = vmatpush.bf16.msra.mxu0 %v3137_v8  ;;  %v3141_v25 = vld [vmem:[%s4150_s1 + $0x48] sm:$0xff]  ;;  %v3140_v29 = vld [vmem:[%s4150_s1 + $0x40] sm:$0xff]  ;;  %v3179_v33 = vld [vmem:[%s4150_s1 + $0x178] sm:$0xff] }
   0xb   :  { %1727 = vmatpush.bf16.msra.mxu1 %v3145_v9  ;;  %v3149_v26 = vld [vmem:[%s4150_s1 + $0x88] sm:$0xff]  ;;  %v3148_v30 = vld [vmem:[%s4150_s1 + $0x80] sm:$0xff]  ;;  %v3187_v42 = vld [vmem:[%s4150_s1 + $0x1b8] sm:$0xff] }
   0xc   :  { %1741 = vmatpush.bf16.msra.mxu2 %v3153_v10  ;;  %v3157_v27 = vld [vmem:[%s4150_s1 + $0xc8] sm:$0xff]  ;;  %v3156_v31 = vld [vmem:[%s4150_s1 + $0xc0] sm:$0xff]  ;;  %v3195_v43 = vld [vmem:[%s4150_s1 + $0x1f8] sm:$0xff] }
   0xd   :  { %1755 = vmatpush.bf16.msra.mxu3 %v3161_v11  ;;  %v2197_v34 = vld [vmem:[%s4151_s0] sm:$0xf]  ;;  %v2205_v36 = vld [vmem:[%s4151_s0 + $0x8] sm:$0xf]  ;;  %v3108_v38 = vld [vmem:[%s4151_s0 + $0x4] sm:$0xf] }
   0xe   :  { %1714 = vmatpush.bf16.msra.mxu0 %v3136_v12  ;;  %v3120_v35 = vld [vmem:[%s4151_s0 + $0x5c] sm:$0xf0]  ;;  %v3121_v37 = vld [vmem:[%s4151_s0 + $0x64] sm:$0xf0]  ;;  %v2199_v39 = vld [vmem:[%s4151_s0 + $0x60] sm:$0xf0] }
   0xf   :  { %1728 = vmatpush.bf16.msra.mxu1 %v3144_v13  ;;  %v3109_v40 = vld [vmem:[%s4151_s0 + $0xc] sm:$0xf]  ;;  %v2198_v44 = vor.u32 %v3120_v35, %v2197_v34  ;;  %v2206_v45 = vor.u32 %v3121_v37, %v2205_v36  ;;  %v2202_v46 = vor.u32 %v3108_v38, %v2199_v39  ;;  %v3170_v48 = vld [vmem:[%s4150_s1 + $0x130] sm:$0xff]  ;;  %v3168_v56 = vld [vmem:[%s4150_s1 + $0x120] sm:$0xff] }
  0x10   :  { %1742 = vmatpush.bf16.msra.mxu2 %v3152_v14  ;;  %v2207_v41 = vld [vmem:[%s4151_s0 + $0x68] sm:$0xf0]  ;;  %v3178_v49 = vld [vmem:[%s4150_s1 + $0x170] sm:$0xff]  ;;  %v3176_v57 = vld [vmem:[%s4150_s1 + $0x160] sm:$0xff] }
  0x11   :  { %1756 = vmatpush.bf16.msra.mxu3 %v3160_v15  ;;  %v2210_v47 = vor.u32 %v3109_v40, %v2207_v41  ;;  %v3186_v50 = vld [vmem:[%s4150_s1 + $0x1b0] sm:$0xff]  ;;  %v3169_v52 = vld [vmem:[%s4150_s1 + $0x128] sm:$0xff]  ;;  %v3184_v58 = vld [vmem:[%s4150_s1 + $0x1a0] sm:$0xff] }
  0x12   :  { %1715 = vmatpush.bf16.msra.mxu0 %v3135_v16  ;;  %v3194_v51 = vld [vmem:[%s4150_s1 + $0x1f0] sm:$0xff]  ;;  %v3177_v53 = vld [vmem:[%s4150_s1 + $0x168] sm:$0xff]  ;;  %v3192_v59 = vld [vmem:[%s4150_s1 + $0x1e0] sm:$0xff] }
  0x13   :  { %1729 = vmatpush.bf16.msra.mxu1 %v3143_v17  ;;  %v3185_v54 = vld [vmem:[%s4150_s1 + $0x1a8] sm:$0xff]  ;;  %v3167_v60 = vld [vmem:[%s4150_s1 + $0x118] sm:$0xff]  ;;  %v3166_v0 = vld [vmem:[%s4150_s1 + $0x110] sm:$0xff] }
  0x14   :  { %1743 = vmatpush.bf16.msra.mxu2 %v3151_v18  ;;  %v3193_v55 = vld [vmem:[%s4150_s1 + $0x1e8] sm:$0xff]  ;;  %v3175_v61 = vld [vmem:[%s4150_s1 + $0x158] sm:$0xff]  ;;  %v3174_v1 = vld [vmem:[%s4150_s1 + $0x150] sm:$0xff] }
  0x15   :  { %1757 = vmatpush.bf16.msra.mxu3 %v3159_v19  ;;  %v3183_v62 = vld [vmem:[%s4150_s1 + $0x198] sm:$0xff]  ;;  %v3182_v2 = vld [vmem:[%s4150_s1 + $0x190] sm:$0xff]  ;;  %v3165_v4 = vld [vmem:[%s4150_s1 + $0x108] sm:$0xff] }
  0x16   :  { %1716 = vmatpush.bf16.msra.mxu0 %v3134_v20  ;;  %v3191_v63 = vld [vmem:[%s4150_s1 + $0x1d8] sm:$0xff]  ;;  %v3190_v3 = vld [vmem:[%s4150_s1 + $0x1d0] sm:$0xff]  ;;  %v3173_v5 = vld [vmem:[%s4150_s1 + $0x148] sm:$0xff] }
  0x17   :  { %1730 = vmatpush.bf16.msra.mxu1 %v3142_v21  ;;  %v3181_v6 = vld [vmem:[%s4150_s1 + $0x188] sm:$0xff]  ;;  %v3164_v8 = vld [vmem:[%s4150_s1 + $0x100] sm:$0xff]  ;;  %v3203_v12 = vld [vmem:[%s4150_s1 + $0x238] sm:$0xff] }
  0x18   :  { %1744 = vmatpush.bf16.msra.mxu2 %v3150_v22  ;;  %v3189_v7 = vld [vmem:[%s4150_s1 + $0x1c8] sm:$0xff]  ;;  %v3172_v9 = vld [vmem:[%s4150_s1 + $0x140] sm:$0xff]  ;;  %v3211_v13 = vld [vmem:[%s4150_s1 + $0x278] sm:$0xff] }
  0x19   :  { %1758 = vmatpush.bf16.msra.mxu3 %v3158_v23  ;;  %v3180_v10 = vld [vmem:[%s4150_s1 + $0x180] sm:$0xff]  ;;  %v2213_v14 = vld [vmem:[%s4151_s0 + $0x10] sm:$0xf]  ;;  %v2221_v16 = vld [vmem:[%s4151_s0 + $0x18] sm:$0xf] }
  0x1a   :  { %1717 = vmatpush.bf16.msra.mxu0 %v3133_v24  ;;  %v3188_v11 = vld [vmem:[%s4150_s1 + $0x1c0] sm:$0xff]  ;;  %v3122_v15 = vld [vmem:[%s4151_s0 + $0x6c] sm:$0xf0]  ;;  %v3123_v17 = vld [vmem:[%s4151_s0 + $0x74] sm:$0xf0] }
  0x1b   :  { %1731 = vmatpush.bf16.msra.mxu1 %v3141_v25  ;;  %v3110_v18 = vld [vmem:[%s4151_s0 + $0x14] sm:$0xf]  ;;  %v3111_v20 = vld [vmem:[%s4151_s0 + $0x1c] sm:$0xf]  ;;  %v2214_v24 = vor.u32 %v3122_v15, %v2213_v14  ;;  %v2222_v25 = vor.u32 %v3123_v17, %v2221_v16  ;;  %v3217_v34 = vld [vmem:[%s4150_s1 + $0x2a8] sm:$0xff] }
  0x1c   :  { %1745 = vmatpush.bf16.msra.mxu2 %v3149_v26  ;;  %v2215_v19 = vld [vmem:[%s4151_s0 + $0x70] sm:$0xf0]  ;;  %v2223_v21 = vld [vmem:[%s4151_s0 + $0x78] sm:$0xf0]  ;;  %v3225_v35 = vld [vmem:[%s4150_s1 + $0x2e8] sm:$0xff] }
  0x1d   :  { %1759 = vmatpush.bf16.msra.mxu3 %v3157_v27  ;;  %v3219_v22 = vld [vmem:[%s4150_s1 + $0x2b8] sm:$0xff]  ;;  %v2218_v26 = vor.u32 %v3110_v18, %v2215_v19  ;;  %v2226_v27 = vor.u32 %v3111_v20, %v2223_v21  ;;  %v3200_v36 = vld [vmem:[%s4150_s1 + $0x220] sm:$0xff]  ;;  %v3249_v14 = vld [vmem:[%s4150_s1 + $0x3a8] sm:$0xff] }
  0x1e   :  { %1718 = vmatpush.bf16.msra.mxu0 %v3132_v28  ;;  %v3227_v23 = vld [vmem:[%s4150_s1 + $0x2f8] sm:$0xff]  ;;  %v3202_v28 = vld [vmem:[%s4150_s1 + $0x230] sm:$0xff]  ;;  %v3208_v37 = vld [vmem:[%s4150_s1 + $0x260] sm:$0xff] }
  0x1f   :  { %1732 = vmatpush.bf16.msra.mxu1 %v3140_v29  ;;  %v3210_v29 = vld [vmem:[%s4150_s1 + $0x270] sm:$0xff]  ;;  %v3216_v38 = vld [vmem:[%s4150_s1 + $0x2a0] sm:$0xff]  ;;  %v3199_v40 = vld [vmem:[%s4150_s1 + $0x218] sm:$0xff] }
  0x20   :  { %1746 = vmatpush.bf16.msra.mxu2 %v3148_v30  ;;  %v3218_v30 = vld [vmem:[%s4150_s1 + $0x2b0] sm:$0xff]  ;;  %v3224_v39 = vld [vmem:[%s4150_s1 + $0x2e0] sm:$0xff]  ;;  %v3207_v41 = vld [vmem:[%s4150_s1 + $0x258] sm:$0xff] }
  0x21   :  { %1760 = vmatpush.bf16.msra.mxu3 %v3156_v31  ;;  %1719 = vmatmul.bf16.vlgmr.msra.gmra.mxu0 %v2198_v44  ;;  %v3226_v31 = vld [vmem:[%s4150_s1 + $0x2f0] sm:$0xff]  ;;  %v3257_v15 = vld [vmem:[%s4150_s1 + $0x3e8] sm:$0xff]  ;;  %v3232_v16 = vld [vmem:[%s4150_s1 + $0x320] sm:$0xff] }
  0x22   :  { %1767 = vmatpush.bf16.msrb.mxu0 %v3171_v32  ;;  %1733 = vmatmul.bf16.vlgmr.msra.gmra.mxu1 %v2202_v46  ;;  %v3201_v32 = vld [vmem:[%s4150_s1 + $0x228] sm:$0xff]  ;;  %v3198_v44 = vld [vmem:[%s4150_s1 + $0x210] sm:$0xff]  ;;  %v3240_v17 = vld [vmem:[%s4150_s1 + $0x360] sm:$0xff] }
  0x23   :  { %1781 = vmatpush.bf16.msrb.mxu1 %v3179_v33  ;;  %1747 = vmatmul.bf16.vlgmr.msra.gmra.mxu2 %v2206_v45  ;;  %v3209_v33 = vld [vmem:[%s4150_s1 + $0x268] sm:$0xff]  ;;  %v3206_v45 = vld [vmem:[%s4150_s1 + $0x250] sm:$0xff]  ;;  %v3248_v18 = vld [vmem:[%s4150_s1 + $0x3a0] sm:$0xff] }
  0x24   :  { %1795 = vmatpush.bf16.msrb.mxu2 %v3187_v42  ;;  %1761 = vmatmul.bf16.vlgmr.msra.gmra.mxu3 %v2210_v47  ;;  %v3215_v42 = vld [vmem:[%s4150_s1 + $0x298] sm:$0xff]  ;;  %v3214_v46 = vld [vmem:[%s4150_s1 + $0x290] sm:$0xff]  ;;  %v3256_v19 = vld [vmem:[%s4150_s1 + $0x3e0] sm:$0xff] }
  0x25   :  { %1809 = vmatpush.bf16.msrb.mxu3 %v3195_v43  ;;  %v3223_v43 = vld [vmem:[%s4150_s1 + $0x2d8] sm:$0xff]  ;;  %v3222_v47 = vld [vmem:[%s4150_s1 + $0x2d0] sm:$0xff] }
  0x26   :  { %1768 = vmatpush.bf16.msrb.mxu0 %v3170_v48  ;;  %v3197_v48 = vld [vmem:[%s4150_s1 + $0x208] sm:$0xff]  ;;  %v3231_v20 = vld [vmem:[%s4150_s1 + $0x318] sm:$0xff] }
  0x27   :  { %1782 = vmatpush.bf16.msrb.mxu1 %v3178_v49  ;;  %v3205_v49 = vld [vmem:[%s4150_s1 + $0x248] sm:$0xff]  ;;  %v3239_v21 = vld [vmem:[%s4150_s1 + $0x358] sm:$0xff] }
  0x28   :  { %1796 = vmatpush.bf16.msrb.mxu2 %v3186_v50  ;;  %v3213_v50 = vld [vmem:[%s4150_s1 + $0x288] sm:$0xff] }
  0x29   :  { %1810 = vmatpush.bf16.msrb.mxu3 %v3194_v51  ;;  %v3221_v51 = vld [vmem:[%s4150_s1 + $0x2c8] sm:$0xff] }
  0x2a   :  { %1769 = vmatpush.bf16.msrb.mxu0 %v3169_v52  ;;  %v3196_v52 = vld [vmem:[%s4150_s1 + $0x200] sm:$0xff] }
  0x2b   :  { %1783 = vmatpush.bf16.msrb.mxu1 %v3177_v53  ;;  %v3204_v53 = vld [vmem:[%s4150_s1 + $0x240] sm:$0xff] }
  0x2c   :  { %1797 = vmatpush.bf16.msrb.mxu2 %v3185_v54  ;;  %v3212_v54 = vld [vmem:[%s4150_s1 + $0x280] sm:$0xff] }
  0x2d   :  { %1811 = vmatpush.bf16.msrb.mxu3 %v3193_v55  ;;  %v3220_v55 = vld [vmem:[%s4150_s1 + $0x2c0] sm:$0xff] }
  0x2e   :  { %1770 = vmatpush.bf16.msrb.mxu0 %v3168_v56  ;;  %v3235_v56 = vld [vmem:[%s4150_s1 + $0x338] sm:$0xff] }
  0x2f   :  { %1784 = vmatpush.bf16.msrb.mxu1 %v3176_v57  ;;  %v3243_v57 = vld [vmem:[%s4150_s1 + $0x378] sm:$0xff] }
  0x30   :  { %1798 = vmatpush.bf16.msrb.mxu2 %v3184_v58  ;;  %v2229_v58 = vld [vmem:[%s4151_s0 + $0x20] sm:$0xf] }
  0x31   :  { %1812 = vmatpush.bf16.msrb.mxu3 %v3192_v59  ;;  %v3124_v59 = vld [vmem:[%s4151_s0 + $0x7c] sm:$0xf0] }
  0x32   :  { %1771 = vmatpush.bf16.msrb.mxu0 %v3167_v60  ;;  %v2237_v60 = vld [vmem:[%s4151_s0 + $0x28] sm:$0xf] }
  0x33   :  { %1785 = vmatpush.bf16.msrb.mxu1 %v3175_v61  ;;  %v3125_v61 = vld [vmem:[%s4151_s0 + $0x84] sm:$0xf0] }
  0x34   :  { %1799 = vmatpush.bf16.msrb.mxu2 %v3183_v62  ;;  %v3112_v62 = vld [vmem:[%s4151_s0 + $0x24] sm:$0xf] }
  0x35   :  { %1813 = vmatpush.bf16.msrb.mxu3 %v3191_v63  ;;  %v2231_v63 = vld [vmem:[%s4151_s0 + $0x80] sm:$0xf0] }
  0x36   :  { %1772 = vmatpush.bf16.msrb.mxu0 %v3166_v0  ;;  %v3113_v0 = vld [vmem:[%s4151_s0 + $0x2c] sm:$0xf] }
  0x37   :  { %1786 = vmatpush.bf16.msrb.mxu1 %v3174_v1  ;;  %v2239_v1 = vld [vmem:[%s4151_s0 + $0x88] sm:$0xf0] }
  0x38   :  { %1800 = vmatpush.bf16.msrb.mxu2 %v3182_v2  ;;  %v3251_v2 = vld [vmem:[%s4150_s1 + $0x3b8] sm:$0xff] }
  0x39   :  { %1814 = vmatpush.bf16.msrb.mxu3 %v3190_v3  ;;  %v3259_v3 = vld [vmem:[%s4150_s1 + $0x3f8] sm:$0xff] }
  0x3a   :  { %1773 = vmatpush.bf16.msrb.mxu0 %v3165_v4  ;;  %v2230_v4 = vor.u32 %v3124_v59, %v2229_v58  ;;  %v3281_v58 = vld [vmem:[%s4150_s1 + $0x4a8] sm:$0xff] }
  0x3b   :  { %1787 = vmatpush.bf16.msrb.mxu1 %v3173_v5  ;;  %v2238_v5 = vor.u32 %v3125_v61, %v2237_v60  ;;  %v3289_v59 = vld [vmem:[%s4150_s1 + $0x4e8] sm:$0xff]  ;;  %v3264_v60 = vld [vmem:[%s4150_s1 + $0x420] sm:$0xff] }
  0x3c   :  { %1801 = vmatpush.bf16.msrb.mxu2 %v3181_v6  ;;  %v2234_v6 = vor.u32 %v3112_v62, %v2231_v63  ;;  %v3272_v61 = vld [vmem:[%s4150_s1 + $0x460] sm:$0xff] }
  0x3d   :  { %1815 = vmatpush.bf16.msrb.mxu3 %v3189_v7  ;;  %v2242_v7 = vor.u32 %v3113_v0, %v2239_v1  ;;  %v3280_v62 = vld [vmem:[%s4150_s1 + $0x4a0] sm:$0xff]  ;;  %v3263_v0 = vld [vmem:[%s4150_s1 + $0x418] sm:$0xff] }
  0x3e   :  { %1774 = vmatpush.bf16.msrb.mxu0 %v3164_v8  ;;  %v3234_v8 = vld [vmem:[%s4150_s1 + $0x330] sm:$0xff]  ;;  %v3288_v63 = vld [vmem:[%s4150_s1 + $0x4e0] sm:$0xff]  ;;  %v3271_v1 = vld [vmem:[%s4150_s1 + $0x458] sm:$0xff] }
  0x3f   :  { %1788 = vmatpush.bf16.msrb.mxu1 %v3172_v9  ;;  %v3242_v9 = vld [vmem:[%s4150_s1 + $0x370] sm:$0xff] }
  0x40   :  { %1802 = vmatpush.bf16.msrb.mxu2 %v3180_v10  ;;  %v3250_v10 = vld [vmem:[%s4150_s1 + $0x3b0] sm:$0xff] }
  0x41   :  { %1816 = vmatpush.bf16.msrb.mxu3 %v3188_v11  ;;  %1775 = vmatmul.bf16.vlgmr.msrb.gmra.mxu0 %v2214_v24  ;;  %v3258_v11 = vld [vmem:[%s4150_s1 + $0x3f0] sm:$0xff] }
  0x42   :  { %1823 = vmatpush.bf16.msra.mxu0 %v3203_v12  ;;  %1789 = vmatmul.bf16.vlgmr.msrb.gmra.mxu1 %v2218_v26  ;;  %v3233_v12 = vld [vmem:[%s4150_s1 + $0x328] sm:$0xff]  ;;  %v3230_v24 = vld [vmem:[%s4150_s1 + $0x310] sm:$0xff] }
  0x43   :  { %1837 = vmatpush.bf16.msra.mxu1 %v3211_v13  ;;  %1803 = vmatmul.bf16.vlgmr.msrb.gmra.mxu2 %v2222_v25  ;;  %v3241_v13 = vld [vmem:[%s4150_s1 + $0x368] sm:$0xff]  ;;  %v3238_v25 = vld [vmem:[%s4150_s1 + $0x350] sm:$0xff] }
  0x44   :  { %1851 = vmatpush.bf16.msra.mxu2 %v3219_v22  ;;  %1817 = vmatmul.bf16.vlgmr.msrb.gmra.mxu3 %v2226_v27  ;;  %v3247_v22 = vld [vmem:[%s4150_s1 + $0x398] sm:$0xff]  ;;  %v3246_v26 = vld [vmem:[%s4150_s1 + $0x390] sm:$0xff] }
  0x45   :  { %1865 = vmatpush.bf16.msra.mxu3 %v3227_v23  ;;  %v3255_v23 = vld [vmem:[%s4150_s1 + $0x3d8] sm:$0xff]  ;;  %v3254_v27 = vld [vmem:[%s4150_s1 + $0x3d0] sm:$0xff] }
  0x46   :  { %1824 = vmatpush.bf16.msra.mxu0 %v3202_v28  ;;  %v3229_v28 = vld [vmem:[%s4150_s1 + $0x308] sm:$0xff] }
  0x47   :  { %1838 = vmatpush.bf16.msra.mxu1 %v3210_v29  ;;  %v3237_v29 = vld [vmem:[%s4150_s1 + $0x348] sm:$0xff] }
  0x48   :  { %1852 = vmatpush.bf16.msra.mxu2 %v3218_v30  ;;  %v3245_v30 = vld [vmem:[%s4150_s1 + $0x388] sm:$0xff] }
  0x49   :  { %1866 = vmatpush.bf16.msra.mxu3 %v3226_v31  ;;  %v3253_v31 = vld [vmem:[%s4150_s1 + $0x3c8] sm:$0xff] }
  0x4a   :  { %1825 = vmatpush.bf16.msra.mxu0 %v3201_v32  ;;  %v3228_v32 = vld [vmem:[%s4150_s1 + $0x300] sm:$0xff] }
  0x4b   :  { %1839 = vmatpush.bf16.msra.mxu1 %v3209_v33  ;;  %v3236_v33 = vld [vmem:[%s4150_s1 + $0x340] sm:$0xff] }
  0x4c   :  { %1853 = vmatpush.bf16.msra.mxu2 %v3217_v34  ;;  %v3244_v34 = vld [vmem:[%s4150_s1 + $0x380] sm:$0xff] }
  0x4d   :  { %1867 = vmatpush.bf16.msra.mxu3 %v3225_v35  ;;  %v3252_v35 = vld [vmem:[%s4150_s1 + $0x3c0] sm:$0xff] }
  0x4e   :  { %1826 = vmatpush.bf16.msra.mxu0 %v3200_v36  ;;  %v3267_v36 = vld [vmem:[%s4150_s1 + $0x438] sm:$0xff] }
  0x4f   :  { %1840 = vmatpush.bf16.msra.mxu1 %v3208_v37  ;;  %v3275_v37 = vld [vmem:[%s4150_s1 + $0x478] sm:$0xff] }
  0x50   :  { %1854 = vmatpush.bf16.msra.mxu2 %v3216_v38  ;;  %v2245_v38 = vld [vmem:[%s4151_s0 + $0x30] sm:$0xf] }
  0x51   :  { %1868 = vmatpush.bf16.msra.mxu3 %v3224_v39  ;;  %v3126_v39 = vld [vmem:[%s4151_s0 + $0x8c] sm:$0xf0] }
  0x52   :  { %1827 = vmatpush.bf16.msra.mxu0 %v3199_v40  ;;  %v2253_v40 = vld [vmem:[%s4151_s0 + $0x38] sm:$0xf] }
  0x53   :  { %1841 = vmatpush.bf16.msra.mxu1 %v3207_v41  ;;  %v3127_v41 = vld [vmem:[%s4151_s0 + $0x94] sm:$0xf0] }
  0x54   :  { %1855 = vmatpush.bf16.msra.mxu2 %v3215_v42  ;;  %v3114_v42 = vld [vmem:[%s4151_s0 + $0x34] sm:$0xf] }
  0x55   :  { %1869 = vmatpush.bf16.msra.mxu3 %v3223_v43  ;;  %v2247_v43 = vld [vmem:[%s4151_s0 + $0x90] sm:$0xf0] }
  0x56   :  { %1828 = vmatpush.bf16.msra.mxu0 %v3198_v44  ;;  %v3115_v44 = vld [vmem:[%s4151_s0 + $0x3c] sm:$0xf] }
  0x57   :  { %1842 = vmatpush.bf16.msra.mxu1 %v3206_v45  ;;  %v2255_v45 = vld [vmem:[%s4151_s0 + $0x98] sm:$0xf0] }
  0x58   :  { %1856 = vmatpush.bf16.msra.mxu2 %v3214_v46  ;;  %v3283_v46 = vld [vmem:[%s4150_s1 + $0x4b8] sm:$0xff] }
  0x59   :  { %1870 = vmatpush.bf16.msra.mxu3 %v3222_v47  ;;  %v3291_v47 = vld [vmem:[%s4150_s1 + $0x4f8] sm:$0xff] }
  0x5a   :  { %1829 = vmatpush.bf16.msra.mxu0 %v3197_v48  ;;  %v2246_v48 = vor.u32 %v3126_v39, %v2245_v38  ;;  %v3313_v38 = vld [vmem:[%s4150_s1 + $0x5a8] sm:$0xff] }
  0x5b   :  { %1843 = vmatpush.bf16.msra.mxu1 %v3205_v49  ;;  %v2254_v49 = vor.u32 %v3127_v41, %v2253_v40  ;;  %v3321_v39 = vld [vmem:[%s4150_s1 + $0x5e8] sm:$0xff]  ;;  %v3296_v40 = vld [vmem:[%s4150_s1 + $0x520] sm:$0xff] }
  0x5c   :  { %1857 = vmatpush.bf16.msra.mxu2 %v3213_v50  ;;  %v2250_v50 = vor.u32 %v3114_v42, %v2247_v43  ;;  %v3304_v41 = vld [vmem:[%s4150_s1 + $0x560] sm:$0xff] }
  0x5d   :  { %1871 = vmatpush.bf16.msra.mxu3 %v3221_v51  ;;  %v2258_v51 = vor.u32 %v3115_v44, %v2255_v45  ;;  %v3312_v42 = vld [vmem:[%s4150_s1 + $0x5a0] sm:$0xff]  ;;  %v3295_v44 = vld [vmem:[%s4150_s1 + $0x518] sm:$0xff] }
  0x5e   :  { %1830 = vmatpush.bf16.msra.mxu0 %v3196_v52  ;;  %v3266_v52 = vld [vmem:[%s4150_s1 + $0x430] sm:$0xff]  ;;  %v3320_v43 = vld [vmem:[%s4150_s1 + $0x5e0] sm:$0xff]  ;;  %v3303_v45 = vld [vmem:[%s4150_s1 + $0x558] sm:$0xff] }
  0x5f   :  { %1844 = vmatpush.bf16.msra.mxu1 %v3204_v53  ;;  %v3274_v53 = vld [vmem:[%s4150_s1 + $0x470] sm:$0xff] }
  0x60   :  { %1858 = vmatpush.bf16.msra.mxu2 %v3212_v54  ;;  %v3282_v54 = vld [vmem:[%s4150_s1 + $0x4b0] sm:$0xff] }
  0x61   :  { %1872 = vmatpush.bf16.msra.mxu3 %v3220_v55  ;;  %1831 = vmatmul.bf16.vlgmr.msra.gmra.mxu0 %v2230_v4  ;;  %v3290_v55 = vld [vmem:[%s4150_s1 + $0x4f0] sm:$0xff] }
  0x62   :  { %1879 = vmatpush.bf16.msrb.mxu0 %v3235_v56  ;;  %1845 = vmatmul.bf16.vlgmr.msra.gmra.mxu1 %v2234_v6  ;;  %v3265_v56 = vld [vmem:[%s4150_s1 + $0x428] sm:$0xff]  ;;  %v3262_v4 = vld [vmem:[%s4150_s1 + $0x410] sm:$0xff] }
  0x63   :  { %1893 = vmatpush.bf16.msrb.mxu1 %v3243_v57  ;;  %1859 = vmatmul.bf16.vlgmr.msra.gmra.mxu2 %v2238_v5  ;;  %v3273_v57 = vld [vmem:[%s4150_s1 + $0x468] sm:$0xff]  ;;  %v3270_v5 = vld [vmem:[%s4150_s1 + $0x450] sm:$0xff] }
  0x64   :  { %1907 = vmatpush.bf16.msrb.mxu2 %v3251_v2  ;;  %1873 = vmatmul.bf16.vlgmr.msra.gmra.mxu3 %v2242_v7  ;;  %v3279_v2 = vld [vmem:[%s4150_s1 + $0x498] sm:$0xff]  ;;  %v3278_v6 = vld [vmem:[%s4150_s1 + $0x490] sm:$0xff] }
  0x65   :  { %1921 = vmatpush.bf16.msrb.mxu3 %v3259_v3  ;;  %v3287_v3 = vld [vmem:[%s4150_s1 + $0x4d8] sm:$0xff]  ;;  %v3286_v7 = vld [vmem:[%s4150_s1 + $0x4d0] sm:$0xff] }
  0x66   :  { %1880 = vmatpush.bf16.msrb.mxu0 %v3234_v8  ;;  %v3261_v8 = vld [vmem:[%s4150_s1 + $0x408] sm:$0xff] }
  0x67   :  { %1894 = vmatpush.bf16.msrb.mxu1 %v3242_v9  ;;  %v3269_v9 = vld [vmem:[%s4150_s1 + $0x448] sm:$0xff] }
  0x68   :  { %1908 = vmatpush.bf16.msrb.mxu2 %v3250_v10  ;;  %v3277_v10 = vld [vmem:[%s4150_s1 + $0x488] sm:$0xff] }
  0x69   :  { %1922 = vmatpush.bf16.msrb.mxu3 %v3258_v11  ;;  %v3285_v11 = vld [vmem:[%s4150_s1 + $0x4c8] sm:$0xff] }
  0x6a   :  { %1881 = vmatpush.bf16.msrb.mxu0 %v3233_v12  ;;  %v3260_v12 = vld [vmem:[%s4150_s1 + $0x400] sm:$0xff] }
  0x6b   :  { %1895 = vmatpush.bf16.msrb.mxu1 %v3241_v13  ;;  %v3268_v13 = vld [vmem:[%s4150_s1 + $0x440] sm:$0xff] }
  0x6c   :  { %1909 = vmatpush.bf16.msrb.mxu2 %v3249_v14  ;;  %v3276_v14 = vld [vmem:[%s4150_s1 + $0x480] sm:$0xff] }
  0x6d   :  { %1923 = vmatpush.bf16.msrb.mxu3 %v3257_v15  ;;  %v3284_v15 = vld [vmem:[%s4150_s1 + $0x4c0] sm:$0xff] }
  0x6e   :  { %1882 = vmatpush.bf16.msrb.mxu0 %v3232_v16  ;;  %v3299_v16 = vld [vmem:[%s4150_s1 + $0x538] sm:$0xff] }
  0x6f   :  { %1896 = vmatpush.bf16.msrb.mxu1 %v3240_v17  ;;  %v3307_v17 = vld [vmem:[%s4150_s1 + $0x578] sm:$0xff] }
  0x70   :  { %1910 = vmatpush.bf16.msrb.mxu2 %v3248_v18  ;;  %v2261_v18 = vld [vmem:[%s4151_s0 + $0x40] sm:$0xf] }
  0x71   :  { %1924 = vmatpush.bf16.msrb.mxu3 %v3256_v19  ;;  %v3128_v19 = vld [vmem:[%s4151_s0 + $0x9c] sm:$0xf0] }
  0x72   :  { %1883 = vmatpush.bf16.msrb.mxu0 %v3231_v20  ;;  %v2269_v20 = vld [vmem:[%s4151_s0 + $0x48] sm:$0xf] }
  0x73   :  { %1897 = vmatpush.bf16.msrb.mxu1 %v3239_v21  ;;  %v3129_v21 = vld [vmem:[%s4151_s0 + $0xa4] sm:$0xf0] }
  0x74   :  { %1911 = vmatpush.bf16.msrb.mxu2 %v3247_v22  ;;  %v3116_v22 = vld [vmem:[%s4151_s0 + $0x44] sm:$0xf] }
  0x75   :  { %1925 = vmatpush.bf16.msrb.mxu3 %v3255_v23  ;;  %v2263_v23 = vld [vmem:[%s4151_s0 + $0xa0] sm:$0xf0] }
  0x76   :  { %1884 = vmatpush.bf16.msrb.mxu0 %v3230_v24  ;;  %v3117_v24 = vld [vmem:[%s4151_s0 + $0x4c] sm:$0xf] }
  0x77   :  { %1898 = vmatpush.bf16.msrb.mxu1 %v3238_v25  ;;  %v2271_v25 = vld [vmem:[%s4151_s0 + $0xa8] sm:$0xf0] }
  0x78   :  { %1912 = vmatpush.bf16.msrb.mxu2 %v3246_v26  ;;  %v3315_v26 = vld [vmem:[%s4150_s1 + $0x5b8] sm:$0xff] }
  0x79   :  { %1926 = vmatpush.bf16.msrb.mxu3 %v3254_v27  ;;  %v3323_v27 = vld [vmem:[%s4150_s1 + $0x5f8] sm:$0xff] }
  0x7a   :  { %1885 = vmatpush.bf16.msrb.mxu0 %v3229_v28  ;;  %v2262_v28 = vor.u32 %v3128_v19, %v2261_v18 }
  0x7b   :  { %1899 = vmatpush.bf16.msrb.mxu1 %v3237_v29  ;;  %v2270_v29 = vor.u32 %v3129_v21, %v2269_v20  ;;  %v3336_v20 = vld [vmem:[%s4152_s2] ss:$0 sm:$0xff] }
  0x7c   :  { %1913 = vmatpush.bf16.msrb.mxu2 %v3245_v30  ;;  %v2266_v30 = vor.u32 %v3116_v22, %v2263_v23 }
  0x7d   :  { %1927 = vmatpush.bf16.msrb.mxu3 %v3253_v31  ;;  %v2274_v31 = vor.u32 %v3117_v24, %v2271_v25 }
  0x7e   :  { %1886 = vmatpush.bf16.msrb.mxu0 %v3228_v32  ;;  %v3298_v32 = vld [vmem:[%s4150_s1 + $0x530] sm:$0xff] }
  0x7f   :  { %1900 = vmatpush.bf16.msrb.mxu1 %v3236_v33  ;;  %v3306_v33 = vld [vmem:[%s4150_s1 + $0x570] sm:$0xff] }
  0x80   :  { %1914 = vmatpush.bf16.msrb.mxu2 %v3244_v34  ;;  %v3314_v34 = vld [vmem:[%s4150_s1 + $0x5b0] sm:$0xff] }
  0x81   :  { %1928 = vmatpush.bf16.msrb.mxu3 %v3252_v35  ;;  %1887 = vmatmul.bf16.vlgmr.msrb.gmra.mxu0 %v2246_v48  ;;  %v3322_v35 = vld [vmem:[%s4150_s1 + $0x5f0] sm:$0xff] }
  0x82   :  { %1935 = vmatpush.bf16.msra.mxu0 %v3267_v36  ;;  %1901 = vmatmul.bf16.vlgmr.msrb.gmra.mxu1 %v2250_v50  ;;  %v3297_v36 = vld [vmem:[%s4150_s1 + $0x528] sm:$0xff]  ;;  %v3294_v48 = vld [vmem:[%s4150_s1 + $0x510] sm:$0xff] }
  0x83   :  { %1949 = vmatpush.bf16.msra.mxu1 %v3275_v37  ;;  %1915 = vmatmul.bf16.vlgmr.msrb.gmra.mxu2 %v2254_v49  ;;  %v3305_v37 = vld [vmem:[%s4150_s1 + $0x568] sm:$0xff]  ;;  %v3302_v49 = vld [vmem:[%s4150_s1 + $0x550] sm:$0xff] }
  0x84   :  { %1963 = vmatpush.bf16.msra.mxu2 %v3283_v46  ;;  %1929 = vmatmul.bf16.vlgmr.msrb.gmra.mxu3 %v2258_v51  ;;  %v3311_v46 = vld [vmem:[%s4150_s1 + $0x598] sm:$0xff]  ;;  %v3310_v50 = vld [vmem:[%s4150_s1 + $0x590] sm:$0xff] }
  0x85   :  { %1977 = vmatpush.bf16.msra.mxu3 %v3291_v47  ;;  %v3319_v47 = vld [vmem:[%s4150_s1 + $0x5d8] sm:$0xff]  ;;  %v3318_v51 = vld [vmem:[%s4150_s1 + $0x5d0] sm:$0xff] }
  0x86   :  { %1936 = vmatpush.bf16.msra.mxu0 %v3266_v52  ;;  %v3293_v52 = vld [vmem:[%s4150_s1 + $0x508] sm:$0xff] }
  0x87   :  { %1950 = vmatpush.bf16.msra.mxu1 %v3274_v53  ;;  %v3301_v53 = vld [vmem:[%s4150_s1 + $0x548] sm:$0xff] }
  0x88   :  { %1964 = vmatpush.bf16.msra.mxu2 %v3282_v54  ;;  %v3309_v54 = vld [vmem:[%s4150_s1 + $0x588] sm:$0xff] }
  0x89   :  { %1978 = vmatpush.bf16.msra.mxu3 %v3290_v55  ;;  %v3317_v55 = vld [vmem:[%s4150_s1 + $0x5c8] sm:$0xff] }
  0x8a   :  { %1937 = vmatpush.bf16.msra.mxu0 %v3265_v56  ;;  %v3292_v56 = vld [vmem:[%s4150_s1 + $0x500] sm:$0xff] }
  0x8b   :  { %1951 = vmatpush.bf16.msra.mxu1 %v3273_v57  ;;  %v3300_v57 = vld [vmem:[%s4150_s1 + $0x540] sm:$0xff] }
  0x8c   :  { %1965 = vmatpush.bf16.msra.mxu2 %v3281_v58  ;;  %v3308_v58 = vld [vmem:[%s4150_s1 + $0x580] sm:$0xff] }
  0x8d   :  { %1979 = vmatpush.bf16.msra.mxu3 %v3289_v59  ;;  %v3316_v59 = vld [vmem:[%s4150_s1 + $0x5c0] sm:$0xff] }
  0x8e   :  { %1938 = vmatpush.bf16.msra.mxu0 %v3264_v60  ;;  %v2277_v60 = vld [vmem:[%s4151_s0 + $0x50] sm:$0xf] }
  0x8f   :  { %1952 = vmatpush.bf16.msra.mxu1 %v3272_v61  ;;  %v3130_v61 = vld [vmem:[%s4151_s0 + $0xac] sm:$0xf0] }
  0x90   :  { %1966 = vmatpush.bf16.msra.mxu2 %v3280_v62  ;;  %v3118_v62 = vld [vmem:[%s4151_s0 + $0x54] sm:$0xf] }
  0x91   :  { %1980 = vmatpush.bf16.msra.mxu3 %v3288_v63  ;;  %v2279_v63 = vld [vmem:[%s4151_s0 + $0xb0] sm:$0xf0] }
  0x92   :  { %1939 = vmatpush.bf16.msra.mxu0 %v3263_v0  ;;  %v2285_v0 = vld [vmem:[%s4151_s0 + $0x58] sm:$0xf] }
  0x93   :  { %1953 = vmatpush.bf16.msra.mxu1 %v3271_v1  ;;  %v3131_v1 = vld [vmem:[%s4151_s0 + $0xb4] sm:$0xf0] }
  0x94   :  { %1967 = vmatpush.bf16.msra.mxu2 %v3279_v2  ;;  %v3119_v2 = vld [vmem:[%s4151_s0 + $0x5c] sm:$0xf] }
  0x95   :  { %1981 = vmatpush.bf16.msra.mxu3 %v3287_v3  ;;  %v2287_v3 = vld [vmem:[%s4151_s0 + $0xb8] sm:$0xf0] }
  0x96   :  { %1940 = vmatpush.bf16.msra.mxu0 %v3262_v4  ;;  %v2278_v4 = vor.u32 %v3130_v61, %v2277_v60  ;;  %v3327_v61 = vld [vmem:[%s4154_s3 + $0x18] sm:$0xff] }
  0x97   :  { %1954 = vmatpush.bf16.msra.mxu1 %v3270_v5  ;;  %v2282_v5 = vor.u32 %v3118_v62, %v2279_v63 }
  0x98   :  { %1968 = vmatpush.bf16.msra.mxu2 %v3278_v6  ;;  %v2286_v6 = vor.u32 %v3131_v1, %v2285_v0  ;;  %v3326_v1 = vld [vmem:[%s4154_s3 + $0x10] sm:$0xff] }
  0x99   :  { %1982 = vmatpush.bf16.msra.mxu3 %v3286_v7  ;;  %v2290_v7 = vor.u32 %v3119_v2, %v2287_v3 }
  0x9a   :  { %1941 = vmatpush.bf16.msra.mxu0 %v3261_v8 }
  0x9b   :  { %1955 = vmatpush.bf16.msra.mxu1 %v3269_v9 }
  0x9c   :  { %1969 = vmatpush.bf16.msra.mxu2 %v3277_v10 }
  0x9d   :  { %1983 = vmatpush.bf16.msra.mxu3 %v3285_v11 }
  0x9e   :  { %1942 = vmatpush.bf16.msra.mxu0 %v3260_v12  ;;  %v1720_v8 = vpop.f32.mrf.mxu0 }
  0x9f   :  { %1956 = vmatpush.bf16.msra.mxu1 %v3268_v13  ;;  %v1734_v9 = vpop.f32.mrf.mxu1  ;;  %v1721_v22 = vadd.f32 %v3336_v20, %v1720_v8  ;;  %v3325_v8 = vld [vmem:[%s4154_s3 + $0x8] sm:$0xff] }
  0xa0   :  { %1970 = vmatpush.bf16.msra.mxu2 %v3276_v14 }
  0xa1   :  { %1984 = vmatpush.bf16.msra.mxu3 %v3284_v15  ;;  %1943 = vmatmul.bf16.vlgmr.msra.gmra.mxu0 %v2262_v28  ;;  %v1735_v24 = vadd.f32 %v1734_v9, %v1721_v22 }
  0xa2   :  { %1991 = vmatpush.bf16.msrb.mxu0 %v3299_v16  ;;  %1957 = vmatmul.bf16.vlgmr.msra.gmra.mxu1 %v2266_v30 }
  0xa3   :  { %2005 = vmatpush.bf16.msrb.mxu1 %v3307_v17  ;;  %1971 = vmatmul.bf16.vlgmr.msra.gmra.mxu2 %v2270_v29 }
  0xa4   :  { %2019 = vmatpush.bf16.msrb.mxu2 %v3315_v26  ;;  %1985 = vmatmul.bf16.vlgmr.msra.gmra.mxu3 %v2274_v31 }
  0xa5   :  { %2033 = vmatpush.bf16.msrb.mxu3 %v3323_v27 }
  0xa6   :  { %1992 = vmatpush.bf16.msrb.mxu0 %v3298_v32  ;;  %v1748_v10 = vpop.f32.mrf.mxu2  ;;  %v1722_v12 = vpop.f32.mrf.mxu0 }
  0xa7   :  { %2006 = vmatpush.bf16.msrb.mxu1 %v3306_v33  ;;  %v1762_v11 = vpop.f32.mrf.mxu3  ;;  %v1736_v13 = vpop.f32.mrf.mxu1  ;;  %v1723_v27 = vadd.f32 %v3336_v20, %v1722_v12  ;;  %v1749_v29 = vadd.f32 %v1748_v10, %v1735_v24 }
  0xa8   :  { %2020 = vmatpush.bf16.msrb.mxu2 %v3314_v34 }
  0xa9   :  { %2034 = vmatpush.bf16.msrb.mxu3 %v3322_v35  ;;  %v1737_v31 = vadd.f32 %v1736_v13, %v1723_v27  ;;  %v1763_v32 = vadd.f32 %v1762_v11, %v1749_v29  ;;  %v3324_v13 = vld [vmem:[%s4154_s3] sm:$0xff] }
  0xaa   :  { %1993 = vmatpush.bf16.msrb.mxu0 %v3297_v36 }
  0xab   :  { %2007 = vmatpush.bf16.msrb.mxu1 %v3305_v37 }
  0xac   :  { %2021 = vmatpush.bf16.msrb.mxu2 %v3313_v38  ;;  %v3331_v38 = vld [vmem:[%s4154_s3 + $0x38] sm:$0xff] }
  0xad   :  { %2035 = vmatpush.bf16.msrb.mxu3 %v3321_v39 }
  0xae   :  { %1994 = vmatpush.bf16.msrb.mxu0 %v3296_v40  ;;  %v1750_v14 = vpop.f32.mrf.mxu2  ;;  %v3330_v40 = vld [vmem:[%s4154_s3 + $0x30] sm:$0xff] }
  0xaf   :  { %2008 = vmatpush.bf16.msrb.mxu1 %v3304_v41  ;;  %v1764_v15 = vpop.f32.mrf.mxu3  ;;  %v1751_v35 = vadd.f32 %v1750_v14, %v1737_v31 }
  0xb0   :  { %2022 = vmatpush.bf16.msrb.mxu2 %v3312_v42 }
  0xb1   :  { %2036 = vmatpush.bf16.msrb.mxu3 %v3320_v43  ;;  %v1765_v39 = vadd.f32 %v1764_v15, %v1751_v35 }
  0xb2   :  { %1995 = vmatpush.bf16.msrb.mxu0 %v3295_v44 }
  0xb3   :  { %2009 = vmatpush.bf16.msrb.mxu1 %v3303_v45 }
  0xb4   :  { %2023 = vmatpush.bf16.msrb.mxu2 %v3311_v46 }
  0xb5   :  { %2037 = vmatpush.bf16.msrb.mxu3 %v3319_v47 }
  0xb6   :  { %1996 = vmatpush.bf16.msrb.mxu0 %v3294_v48 }
  0xb7   :  { %2010 = vmatpush.bf16.msrb.mxu1 %v3302_v49 }
  0xb8   :  { %2024 = vmatpush.bf16.msrb.mxu2 %v3310_v50  ;;  %v3329_v50 = vld [vmem:[%s4154_s3 + $0x28] sm:$0xff] }
  0xb9   :  { %2038 = vmatpush.bf16.msrb.mxu3 %v3318_v51 }
  0xba   :  { %1997 = vmatpush.bf16.msrb.mxu0 %v3293_v52 }
  0xbb   :  { %2011 = vmatpush.bf16.msrb.mxu1 %v3301_v53 }
  0xbc   :  { %2025 = vmatpush.bf16.msrb.mxu2 %v3309_v54 }
  0xbd   :  { %2039 = vmatpush.bf16.msrb.mxu3 %v3317_v55 }
  0xbe   :  { %1998 = vmatpush.bf16.msrb.mxu0 %v3292_v56  ;;  %v1776_v16 = vpop.f32.mrf.mxu0  ;;  %v3328_v56 = vld [vmem:[%s4154_s3 + $0x20] sm:$0xff] }
  0xbf   :  { %2012 = vmatpush.bf16.msrb.mxu1 %v3300_v57  ;;  %v1790_v17 = vpop.f32.mrf.mxu1  ;;  %v1777_v36 = vadd.f32 %v1776_v16, %v1763_v32 }
  0xc0   :  { %2026 = vmatpush.bf16.msrb.mxu2 %v3308_v58 }
  0xc1   :  { %2040 = vmatpush.bf16.msrb.mxu3 %v3316_v59  ;;  %1999 = vmatmul.bf16.vlgmr.msrb.gmra.mxu0 %v2278_v4  ;;  %v1791_v42 = vadd.f32 %v1790_v17, %v1777_v36 }
  0xc2   :  { %2013 = vmatmul.bf16.vlgmr.msrb.gmra.mxu1 %v2282_v5  ;;  %2118 = vmatpush.bf16.msra.mxu0 %v3331_v38 }
  0xc3   :  { %2027 = vmatmul.bf16.vlgmr.msrb.gmra.mxu2 %v2286_v6 }
  0xc4   :  { %2041 = vmatmul.bf16.vlgmr.msrb.gmra.mxu3 %v2290_v7 }
  0xc6   :  { %v1804_v18 = vpop.f32.mrf.mxu2  ;;  %v1778_v21 = vpop.f32.mrf.mxu0  ;;  %2119 = vmatpush.bf16.msra.mxu0 %v3330_v40 }
  0xc7   :  { %v1818_v19 = vpop.f32.mrf.mxu3  ;;  %v1792_v23 = vpop.f32.mrf.mxu1  ;;  %v1779_v43 = vadd.f32 %v1778_v21, %v1765_v39  ;;  %v1805_v46 = vadd.f32 %v1804_v18, %v1791_v42  ;;  %v3335_v21 = vld [vmem:[%s4155_s5 + $0x18] sm:$0xff] }
  0xc8   :  { %2179 = vmatpush.bf16.msra.mxu1 %v3335_v21 }
  0xc9   :  { %v1793_v48 = vadd.f32 %v1792_v23, %v1779_v43  ;;  %v1819_v51 = vadd.f32 %v1818_v19, %v1805_v46 }
  0xca   :  { %2120 = vmatpush.bf16.msra.mxu0 %v3329_v50 }
  0xce   :  { %v1806_v25 = vpop.f32.mrf.mxu2  ;;  %2121 = vmatpush.bf16.msra.mxu0 %v3328_v56 }
  0xcf   :  { %v1820_v26 = vpop.f32.mrf.mxu3  ;;  %v1807_v52 = vadd.f32 %v1806_v25, %v1793_v48 }
  0xd1   :  { %v1821_v57 = vadd.f32 %v1820_v26, %v1807_v52 }
  0xd2   :  { %2122 = vmatpush.bf16.msra.mxu0 %v3327_v61 }
  0xd6   :  { %2123 = vmatpush.bf16.msra.mxu0 %v3326_v1 }
  0xda   :  { %2124 = vmatpush.bf16.msra.mxu0 %v3325_v8 }
  0xde   :  { %v1832_v28 = vpop.f32.mrf.mxu0  ;;  %2125 = vmatpush.bf16.msra.mxu0 %v3324_v13 }
  0xdf   :  { %v1846_v30 = vpop.f32.mrf.mxu1  ;;  %v1833_v53 = vadd.f32 %v1832_v28, %v1819_v51 }
  0xe1   :  { %v1847_v58 = vadd.f32 %v1846_v30, %v1833_v53  ;;  %v3334_v53 = vld [vmem:[%s4155_s5 + $0x10] sm:$0xff] }
  0xe2   :  { %2180 = vmatpush.bf16.msra.mxu1 %v3334_v53 }
  0xe6   :  { %v1860_v33 = vpop.f32.mrf.mxu2  ;;  %v1834_v37 = vpop.f32.mrf.mxu0 }
  0xe7   :  { %v1874_v34 = vpop.f32.mrf.mxu3  ;;  %v1848_v41 = vpop.f32.mrf.mxu1  ;;  %v1835_v59 = vadd.f32 %v1834_v37, %v1821_v57  ;;  %v1861_v62 = vadd.f32 %v1860_v33, %v1847_v58  ;;  %v3337_v57 = vld [vmem:[%s4153_s4] ss:$0 sm:$0xff] }
  0xe9   :  { %v1849_v0 = vadd.f32 %v1848_v41, %v1835_v59  ;;  %v1875_v2 = vadd.f32 %v1874_v34, %v1861_v62 }
  0xee   :  { %v1862_v44 = vpop.f32.mrf.mxu2 }
  0xef   :  { %v1876_v45 = vpop.f32.mrf.mxu3  ;;  %v1863_v3 = vadd.f32 %v1862_v44, %v1849_v0  ;;  %v3338_v0 = vld [vmem:[%s4156_s6] ss:$0 sm:$0xff] }
  0xf1   :  { %v1877_v9 = vadd.f32 %v1876_v45, %v1863_v3 }
  0xfe   :  { %v1888_v47 = vpop.f32.mrf.mxu0 }
  0xff   :  { %v1902_v49 = vpop.f32.mrf.mxu1  ;;  %v1889_v6 = vadd.f32 %v1888_v47, %v1875_v2 }
 0x101   :  { %v1903_v11 = vadd.f32 %v1902_v49, %v1889_v6 }
 0x106   :  { %v1916_v54 = vpop.f32.mrf.mxu2  ;;  %v1890_v60 = vpop.f32.mrf.mxu0 }
 0x107   :  { %v1930_v55 = vpop.f32.mrf.mxu3  ;;  %v1904_v63 = vpop.f32.mrf.mxu1  ;;  %v1891_v12 = vadd.f32 %v1890_v60, %v1877_v9  ;;  %v1917_v14 = vadd.f32 %v1916_v54, %v1903_v11  ;;  %v3333_v54 = vld [vmem:[%s4155_s5 + $0x8] sm:$0xff] }
 0x108   :  { %2181 = vmatpush.bf16.msra.mxu1 %v3333_v54 }
 0x109   :  { %v1905_v17 = vadd.f32 %v1904_v63, %v1891_v12  ;;  %v1931_v18 = vadd.f32 %v1930_v55, %v1917_v14  ;;  %v3332_v55 = vld [vmem:[%s4155_s5] sm:$0xff] }
 0x10c   :  { %2182 = vmatpush.bf16.msra.mxu1 %v3332_v55 }
 0x10e   :  { %v1918_v4 = vpop.f32.mrf.mxu2 }
 0x10f   :  { %v1932_v5 = vpop.f32.mrf.mxu3  ;;  %v1919_v19 = vadd.f32 %v1918_v4, %v1905_v17 }
 0x111   :  { %v1933_v24 = vadd.f32 %v1932_v5, %v1919_v19 }
 0x11e   :  { %v1944_v7 = vpop.f32.mrf.mxu0 }
 0x11f   :  { %v1958_v10 = vpop.f32.mrf.mxu1  ;;  %v1945_v22 = vadd.f32 %v1944_v7, %v1931_v18 }
 0x121   :  { %v1959_v25 = vadd.f32 %v1958_v10, %v1945_v22 }
 0x126   :  { %v1972_v15 = vpop.f32.mrf.mxu2  ;;  %v1946_v20 = vpop.f32.mrf.mxu0 }
 0x127   :  { %v1986_v16 = vpop.f32.mrf.mxu3  ;;  %v1960_v23 = vpop.f32.mrf.mxu1  ;;  %v1947_v26 = vadd.f32 %v1946_v20, %v1933_v24  ;;  %v1973_v29 = vadd.f32 %v1972_v15, %v1959_v25 }
 0x129   :  { %v1961_v31 = vadd.f32 %v1960_v23, %v1947_v26  ;;  %v1987_v33 = vadd.f32 %v1986_v16, %v1973_v29 }
 0x12e   :  { %v1974_v27 = vpop.f32.mrf.mxu2 }
 0x12f   :  { %v1988_v28 = vpop.f32.mrf.mxu3  ;;  %v1975_v34 = vadd.f32 %v1974_v27, %v1961_v31 }
 0x131   :  { %v1989_v38 = vadd.f32 %v1988_v28, %v1975_v34 }
 0x13e   :  { %v2000_v30 = vpop.f32.mrf.mxu0 }
 0x13f   :  { %v2014_v32 = vpop.f32.mrf.mxu1  ;;  %v2001_v35 = vadd.f32 %v2000_v30, %v1987_v33 }
 0x141   :  { %v2015_v40 = vadd.f32 %v2014_v32, %v2001_v35 }
 0x146   :  { %v2028_v36 = vpop.f32.mrf.mxu2  ;;  %v2002_v39 = vpop.f32.mrf.mxu0 }
 0x147   :  { %v2042_v37 = vpop.f32.mrf.mxu3  ;;  %v2003_v41 = vadd.f32 %v2002_v39, %v1989_v38  ;;  %v2029_v42 = vadd.f32 %v2028_v36, %v2015_v40  ;;  %v2016_v43 = vpop.f32.mrf.mxu1 }
 0x149   :  { %v2017_v44 = vadd.f32 %v2016_v43, %v2003_v41  ;;  %v2043_v46 = vadd.f32 %v2042_v37, %v2029_v42 }
 0x14b   :  { %v2047_v50 = vmax.f32 %v2043_v46, 0.0 }
 0x14e   :  { %v2030_v45 = vpop.f32.mrf.mxu2 }
 0x14f   :  { %v2031_v47 = vadd.f32 %v2030_v45, %v2017_v44  ;;  %v2044_v48 = vpop.f32.mrf.mxu3 }
 0x151   :  { %v2045_v49 = vadd.f32 %v2044_v48, %v2031_v47 }
 0x153   :  { %v2048_v51 = vmax.f32 %v2045_v49, 0.0 }
 0x155   :  { %v2049_v52 = vpack.c.bf16 %v2048_v51, %v2047_v50 }
 0x157   :  { %2126 = vmatmul.bf16.vlgmr.msra.gmra.mxu0 %v2049_v52 }
 0x1d4   :  { %v2127_v56 = vpop.f32.mrf.mxu0 }
 0x1d5   :  { %v2128_v58 = vadd.f32 %v3337_v57, %v2127_v56 }
 0x1d7   :  { %v2132_v61 = vmax.f32 %v2128_v58, 0.0 }
 0x1dc   :  { %v2129_v59 = vpop.f32.mrf.mxu0 }
 0x1dd   :  { %v2130_v60 = vadd.f32 %v3337_v57, %v2129_v59 }
 0x1df   :  { %v2133_v62 = vmax.f32 %v2130_v60, 0.0 }
 0x1e1   :  { %v2134_v63 = vpack.c.bf16 %v2133_v62, %v2132_v61 }
 0x1e3   :  { %3107 = vmatmul.msk.bf16.vlgmr.msra.gmra.mxu1 %vm2171_vm0, %v2134_v63 }
 0x260   :  { %v2184_v1 = vpop.f32.mrf.mxu1 }
 0x261   :  { %v2185_v2 = vadd.f32 %v3338_v0, %v2184_v1 }
 0x263   :  { %2189 = vst [vmem:[%s4157_s7] sm:$0xff] %v2185_v2 }
 0x268   :  { %v2186_v3 = vpop.f32.mrf.mxu1 }
 0x269   :  { %v2187_v4 = vadd.f32 %v3338_v0, %v2186_v3 }
 0x26b   :  { %2190 = vst [vmem:[%s4157_s7 + $0x8] sm:$0xff] %v2187_v4 }

</bundles_post_ra>
